<compile_context>
chip_gen: v7x
topology: tpu7x:2x2x1
jax: 0.10.0
libtpu: 0.0.40
codegen_flags: <defaults>
</compile_context>

<pallas_src>
import jax
import jax.numpy as jnp
from jax import lax
from jax.experimental import pallas as pl
from jax.experimental.pallas import tpu as pltpu

# ODE integration horizon [0, 1] with fixed-step Euler.
# TODO(synk): adaptive-step torchdiffeq solvers (rtol/atol/adjoint, dopri5)
# have no clean Pallas equivalent; fixed-step Euler over [0, 1] is used.
ODE_T0 = 0.0
ODE_T1 = 1.0
ODE_STEPS = 4


def _make_fused_kernel(T, N, D):
    """Build the fused encode -> ODE -> decode kernel for static (T, N, D)."""

    def kernel(x_ref, wenc_ref, w1_ref, w2_ref, b12_ref, adj_ref):
        # ---- EncodingLayer: one fused matmul over all T*N node rows --------
        # Bias is already folded into wenc via the ones column of x.
        z = jnp.dot(x_ref[...], wenc_ref[...],
                    preferred_element_type=jnp.float32)          # [T*N, D]
        z = jnp.maximum(z, 0.0)

        # ---- ODEBlock: fixed-step Euler over t in [0, 1] --------------------
        w1 = w1_ref[...]
        w2 = w2_ref[...]
        b12 = b12_ref[...]
        b1 = b12[0:1, :]                                          # [1, D]
        b2 = b12[1:2, :]                                          # [1, D]
        dt = (ODE_T1 - ODE_T0) / ODE_STEPS

        def euler_step(_, h):
            f = jnp.tanh(jnp.dot(h, w1,
                                 preferred_element_type=jnp.float32) + b1)
            f = jnp.dot(f, w2, preferred_element_type=jnp.float32) + b2
            return h + dt * f

        h = lax.fori_loop(0, ODE_STEPS, euler_step, z)            # [T*N, D]

        # ---- DecodingLayer: batched inner-product decoder -------------------
        # Leading-dim split (no lane relayout), then one batched dot_general
        # contracting the LAST dims of both operands (no transpose).
        h3 = h.reshape(T, N, D)
        logits = lax.dot_general(
            h3, h3,
            dimension_numbers=(((2,), (2,)), ((0,), (0,))),
            preferred_element_type=jnp.float32)                   # [T, N, N]

        # Lane-dense store: flatten the per-snapshot N x N block into the
        # lane axis (N*N = 256, a multiple of 128) -> unmasked full vst's.
        adj_ref[...] = jax.nn.sigmoid(logits).reshape(T, N * N)

    return kernel


def mymodel_forward(feat, gdv, pr, params):
    """feat: [T,N,F], gdv: [T,N,G], pr: [T,N,1] (f32) -> adj: [T,N,N] f32."""
    T, N, F = feat.shape
    G = gdv.shape[-1]
    P = pr.shape[-1]
    K = F + G + P
    D = params["wf"].shape[-1]

    # Fuse the three encoder projections AND the encoder bias into a single
    # matmul: x_aug = [feat | gdv | pr | 1], w_aug = [Wf; Wg; Wp; b_enc].
    ones = jnp.ones((T, N, 1), jnp.float32)
    x_aug = jnp.concatenate([feat, gdv, pr, ones],
                            axis=-1).reshape(T * N, K + 1)
    w_aug = jnp.concatenate(
        [params["wf"], params["wg"], params["wp"], params["be"]], axis=0)
    b12 = jnp.concatenate([params["b1"], params["b2"]], axis=0)   # [2, D]

    vmem = pl.BlockSpec(memory_space=pltpu.MemorySpace.VMEM)
    out_flat = pl.pallas_call(
        _make_fused_kernel(T, N, D),
        out_shape=jax.ShapeDtypeStruct((T, N * N), jnp.float32),
        in_specs=[vmem, vmem, vmem, vmem, vmem],
        out_specs=vmem,
    )(x_aug, w_aug, params["w1"], params["w2"], b12)

    # Metadata-only reshape back to (T, N, N).
    return out_flat.reshape(T, N, N)


def init_params(key, num_feat, num_gdv, num_pr, enc_dim):
    ks = jax.random.split(key, 8)
    s = lambda k, shape, fan_in: (jax.random.normal(k, shape, jnp.float32)
                                  / jnp.sqrt(jnp.float32(fan_in)))
    return {
        "wf": s(ks[0], (num_feat, enc_dim), num_feat),
        "wg": s(ks[1], (num_gdv, enc_dim), num_gdv),
        "wp": s(ks[2], (num_pr, enc_dim), num_pr),
        "be": jnp.zeros((1, enc_dim), jnp.float32),
        "w1": s(ks[3], (enc_dim, enc_dim), enc_dim),
        "b1": jnp.zeros((1, enc_dim), jnp.float32),
        "w2": s(ks[4], (enc_dim, enc_dim), enc_dim),
        "b2": jnp.zeros((1, enc_dim), jnp.float32),
    }


if __name__ == "__main__":
    # Small, forward-consistent shapes:
    #   time_length = 6, tasktype != 'multisteps' -> T = time_length - 1 = 5
    #   N (nodes) = 16, num_feat = 8, num_gdv = 4, num_pr = 1,
    #   encoding_layer_config = 32
    time_length = 6
    T = time_length - 1
    N, num_feat, num_gdv, num_pr, enc_dim = 16, 8, 4, 1, 32

    key = jax.random.PRNGKey(0)
    k_feat, k_gdv, k_pr, k_param = jax.random.split(key, 4)

    feat = jax.random.normal(k_feat, (T, N, num_feat), jnp.float32)
    gdv = jax.random.normal(k_gdv, (T, N, num_gdv), jnp.float32)
    pr = jax.random.uniform(k_pr, (T, N, num_pr), jnp.float32)

    params = init_params(k_param, num_feat, num_gdv, num_pr, enc_dim)

    adj = mymodel_forward(feat, gdv, pr, params)
    jax.block_until_ready(adj)

    assert adj.shape == (T, N, N), adj.shape
    assert adj.dtype == jnp.float32
    assert bool(jnp.all(jnp.isfinite(adj)))
    assert bool(jnp.all((adj >= 0.0) & (adj <= 1.0)))
    print("KERNEL_OK")
</pallas_src>

<mosaic_0001>
module attributes {stable_mosaic.version = 11 : i64} {
  func.func @kernel(%arg0: memref<80x14xf32, #tpu.memory_space<vmem>>, %arg1: memref<14x32xf32, #tpu.memory_space<vmem>>, %arg2: memref<32x32xf32, #tpu.memory_space<vmem>>, %arg3: memref<32x32xf32, #tpu.memory_space<vmem>>, %arg4: memref<2x32xf32, #tpu.memory_space<vmem>>, %arg5: memref<5x256xf32, #tpu.memory_space<vmem>>) attributes {dimension_semantics = [], scalar_prefetch = 0 : i64, scratch_operands = 0 : i64, tpu.core_type = #tpu.core_type<tc>} {
    %c0 = arith.constant 0 : index
    %c0_0 = arith.constant 0 : index
    %0 = vector.load %arg0[%c0, %c0_0] : memref<80x14xf32, #tpu.memory_space<vmem>>, vector<80x14xf32>
    %c0_1 = arith.constant 0 : index
    %c0_2 = arith.constant 0 : index
    %1 = vector.load %arg1[%c0_1, %c0_2] : memref<14x32xf32, #tpu.memory_space<vmem>>, vector<14x32xf32>
    %cst = arith.constant dense<0.000000e+00> : vector<80x32xf32>
    %2 = tpu.matmul %0, %1, %cst {dimension_numbers = #tpu.dot_dimension_numbers<[1], [0], [0], [1], [0, 0, 1, 1], [], []>} : vector<80x14xf32>, vector<14x32xf32>, vector<80x32xf32> -> vector<80x32xf32>
    %cst_3 = arith.constant 0.000000e+00 : f32
    %3 = vector.broadcast %cst_3 : f32 to vector<80x32xf32>
    %4 = arith.maximumf %2, %3 : vector<80x32xf32>
    %c0_4 = arith.constant 0 : index
    %c0_5 = arith.constant 0 : index
    %5 = vector.load %arg2[%c0_4, %c0_5] : memref<32x32xf32, #tpu.memory_space<vmem>>, vector<32x32xf32>
    %c0_6 = arith.constant 0 : index
    %c0_7 = arith.constant 0 : index
    %6 = vector.load %arg3[%c0_6, %c0_7] : memref<32x32xf32, #tpu.memory_space<vmem>>, vector<32x32xf32>
    %c0_8 = arith.constant 0 : index
    %c0_9 = arith.constant 0 : index
    %7 = vector.load %arg4[%c0_8, %c0_9] : memref<2x32xf32, #tpu.memory_space<vmem>>, vector<2x32xf32>
    %8 = vector.extract_strided_slice %7 {offsets = [0, 0], sizes = [1, 32], strides = [1, 1]} : vector<2x32xf32> to vector<1x32xf32>
    %9 = vector.extract_strided_slice %7 {offsets = [1, 0], sizes = [1, 32], strides = [1, 1]} : vector<2x32xf32> to vector<1x32xf32>
    %c0_i32 = arith.constant 0 : i32
    %c4_i32 = arith.constant 4 : i32
    %10 = arith.addi %c0_i32, %c4_i32 : i32
    %c1_i32 = arith.constant 1 : i32
    %11 = scf.for %arg6 = %c0_i32 to %10 step %c1_i32 iter_args(%arg7 = %4) -> (vector<80x32xf32>)  : i32 {
      %cst_14 = arith.constant dense<0.000000e+00> : vector<80x32xf32>
      %21 = tpu.matmul %arg7, %5, %cst_14 {dimension_numbers = #tpu.dot_dimension_numbers<[1], [0], [0], [1], [0, 0, 1, 1], [], []>} : vector<80x32xf32>, vector<32x32xf32>, vector<80x32xf32> -> vector<80x32xf32>
      %22 = vector.broadcast %8 : vector<1x32xf32> to vector<80x32xf32>
      %23 = arith.addf %21, %22 : vector<80x32xf32>
      %24 = math.tanh %23 : vector<80x32xf32>
      %cst_15 = arith.constant dense<0.000000e+00> : vector<80x32xf32>
      %25 = tpu.matmul %24, %6, %cst_15 {dimension_numbers = #tpu.dot_dimension_numbers<[1], [0], [0], [1], [0, 0, 1, 1], [], []>} : vector<80x32xf32>, vector<32x32xf32>, vector<80x32xf32> -> vector<80x32xf32>
      %26 = vector.broadcast %9 : vector<1x32xf32> to vector<80x32xf32>
      %27 = arith.addf %25, %26 : vector<80x32xf32>
      %cst_16 = arith.constant 2.500000e-01 : f32
      %28 = vector.broadcast %cst_16 : f32 to vector<80x32xf32>
      %29 = arith.mulf %28, %27 : vector<80x32xf32>
      %30 = arith.addf %arg7, %29 : vector<80x32xf32>
      scf.yield %30 : vector<80x32xf32>
    }
    %12 = vector.shape_cast %11 : vector<80x32xf32> to vector<5x16x32xf32>
    %cst_10 = arith.constant dense<0.000000e+00> : vector<5x16x16xf32>
    %13 = tpu.matmul %12, %12, %cst_10 {dimension_numbers = #tpu.dot_dimension_numbers<[2], [2], [1], [1], [0, 0, 0, 1, 1, 1], [0], [0]>} : vector<5x16x32xf32>, vector<5x16x32xf32>, vector<5x16x16xf32> -> vector<5x16x16xf32>
    %14 = arith.negf %13 : vector<5x16x16xf32>
    %15 = math.exp %14 : vector<5x16x16xf32>
    %cst_11 = arith.constant 1.000000e+00 : f32
    %16 = vector.broadcast %cst_11 : f32 to vector<5x16x16xf32>
    %17 = arith.addf %16, %15 : vector<5x16x16xf32>
    %18 = arith.divf %16, %17 : vector<5x16x16xf32>
    %19 = vector.shape_cast %18 : vector<5x16x16xf32> to vector<5x256xf32>
    %c0_12 = arith.constant 0 : index
    %c0_13 = arith.constant 0 : index
    %20 = vector.load %arg5[%c0_12, %c0_13] : memref<5x256xf32, #tpu.memory_space<vmem>>, vector<5x256xf32>
    tpu.vector_store %arg5[%c0_12, %c0_13], %19 {strides = array<i32>} : memref<5x256xf32, #tpu.memory_space<vmem>>, vector<5x256xf32>,
    return
  }
}

</mosaic_0001>

<bundles_post_ra>
// kernel: tpu_custom_call.1
= control target key start
LH: loop header
LB: loop body
LE: loop exit
PB: predicated region body
PF: predicated region fallthrough
CT: control target
= control target key end

     0   :  { %10 = vsyncpa [#allocation3], 0  ;;  %vm64_vm0 = vcmask 1045504   ;;  %vm33_vm1 = vcmask 113664   ;;  %vm1921_vm2 = vmmov 1   ;;  %s2260_s0 = inlined_call_operand.vmem [shape: f32[80,14], index: 0, kind: input, shape index: {}]   ;;  %s2261_s1 = inlined_call_operand.vmem [shape: f32[14,32], index: 1, kind: input, shape index: {}]   ;;  %s2262_s2 = inlined_call_operand.vmem [shape: f32[32,32], index: 2, kind: input, shape index: {}]   ;;  %s2263_s3 = inlined_call_operand.vmem [shape: f32[32,32], index: 3, kind: input, shape index: {}]   ;;  %s2264_s4 = inlined_call_operand.vmem [shape: f32[2,32], index: 4, kind: input, shape index: {}]   ;;  %s2265_s5 = inlined_call_operand.hbm [shape: f32[5,256], index: 5, kind: output, shape index: {}]  }
   0x1   :  { %v31_v0 = vld [vmem:[%s2261_s1] sm:$0xff]  ;;  %v32_v1 = vld [vmem:[%s2261_s1 + $0x8] sm:$0x3f]  ;;  %v27_v4 = vld [vmem:[%s2260_s0 + $0x30] sm:$0xff] }
   0x2   :  { %v1595_v2 = vpack.c.bf16 %v32_v1, %v31_v0  ;;  %v21_v3 = vld [vmem:[%s2260_s0] sm:$0xff]  ;;  %vm1596_vm3 = vmpackc.low %vm64_vm0, %vm1921_vm2  ;;  %1508 = vmatprep.mubr.msk.f32.mxu1 %vm33_vm1, %v27_v4  ;;  %v22_v5 = vld [vmem:[%s2260_s0 + $0x8] sm:$0xff] }
   0x3   :  { %1499 = vmatprep.mubr.msk.f32.mxu0 %vm33_vm1, %v21_v3  ;;  %v28_v6 = vld [vmem:[%s2260_s0 + $0x38] sm:$0xff]  ;;  %v23_v7 = vld [vmem:[%s2260_s0 + $0x10] sm:$0xff]  ;;  %v29_v8 = vld [vmem:[%s2260_s0 + $0x40] sm:$0xff] }
   0x4   :  { %1597 = vmatprep.subr.msk.bf16.mxu0 %vm1596_vm3, %v1595_v2  ;;  %1647 = vmatprep.subr.msk.bf16.mxu1 %vm1596_vm3, %v1595_v2  ;;  %v24_v9 = vld [vmem:[%s2260_s0 + $0x18] sm:$0xff]  ;;  %v30_v10 = vld [vmem:[%s2260_s0 + $0x48] sm:$0xff]  ;;  %v25_v11 = vld [vmem:[%s2260_s0 + $0x20] sm:$0xff] }
   0x5   :  { %1600 = vmatpush3.bf16.msk.msra.mxu0 %vm1596_vm3, %v1595_v2  ;;  %1648 = vmatpush3.bf16.msk.msra.mxu1 %vm1596_vm3, %v1595_v2  ;;  %v26_v12 = vld [vmem:[%s2260_s0 + $0x28] sm:$0xff]  ;;  %v2012_v13 = vld [vmem:[%s2262_s2] sm:$0xff]  ;;  %v2022_v15 = vld [vmem:[%s2262_s2 + $0x10] sm:$0xff] }
   0x6   :  { %v2017_v14 = vld [vmem:[%s2262_s2 + $0x8] sm:$0xff]  ;;  %v2027_v16 = vld [vmem:[%s2262_s2 + $0x18] sm:$0xff]  ;;  %v2032_v17 = vld [vmem:[%s2263_s3] sm:$0xff] }
   0x7   :  { %v2037_v18 = vld [vmem:[%s2263_s3 + $0x8] sm:$0xff]  ;;  %v2042_v19 = vld [vmem:[%s2263_s3 + $0x10] sm:$0xff]  ;;  %v2047_v20 = vld [vmem:[%s2263_s3 + $0x18] sm:$0xff]  ;;  %s2074_s3 = smov 0  }
   0x8   :  { %1500 = vmatmul.mubr.msk.f32.vlgmr.msra.gmra.mrb[0].mxu0 %vm33_vm1, %v22_v5  ;;  %1509 = vmatmul.mubr.msk.f32.vlgmr.msra.gmra.mrb[0].mxu1 %vm33_vm1, %v28_v6  ;;  %v2052_v21 = vld [vmem:[%s2264_s4] sm:$0x3] }
   0x9   :  { %1502 = vmatprep.mubr.msk.f32.mxu0 %vm33_vm1, %v23_v7  ;;  %1511 = vmatprep.mubr.msk.f32.mxu1 %vm33_vm1, %v29_v8 }
   0xc   :  { %1503 = vmatmul.mubr.msk.f32.gmra.mrb[2].mxu0 %vm33_vm1, %v24_v9  ;;  %1512 = vmatmul.mubr.msk.f32.gmra.mrb[2].mxu1 %vm33_vm1, %v30_v10 }
   0xd   :  { %1505 = vmatprep.mubr.msk.f32.mxu0 %vm33_vm1, %v25_v11 }
  0x10   :  { %1506 = vmatmul.mubr.msk.f32.gmra.mrb[4].mxu0 %vm33_vm1, %v26_v12 }
  0xdb   :  { %v1501_v22 = vpop.f32.mrb[0].mxu0  ;;  %v1510_v23 = vpop.f32.mrb[0].mxu1 }
  0xdc   :  { %v184_v24 = vmax.f32 %v1501_v22, 0.0   ;;  %v134_v25 = vpop.f32.mrb[1].mxu0  ;;  %v190_v26 = vmax.f32 %v1510_v23, 0.0   ;;  %v164_v27 = vpop.f32.mrb[1].mxu1 }
  0xdd   :  { %v183_v28 = vmax.f32 %v134_v25, 0.0   ;;  %v189_v29 = vmax.f32 %v164_v27, 0.0  }
  0xdf   :  { %v1504_v30 = vpop.f32.mrb[2].mxu0  ;;  %v1513_v31 = vpop.f32.mrb[2].mxu1 }
  0xe0   :  { %v186_v32 = vmax.f32 %v1504_v30, 0.0   ;;  %v144_v33 = vpop.f32.mrb[3].mxu0  ;;  %v192_v34 = vmax.f32 %v1513_v31, 0.0   ;;  %v174_v35 = vpop.f32.mrb[3].mxu1 }
  0xe1   :  { %v185_v36 = vmax.f32 %v144_v33, 0.0   ;;  %v191_v37 = vmax.f32 %v174_v35, 0.0  }
  0xe3   :  { %v1507_v38 = vpop.f32.mrb[4].mxu0 }
  0xe4   :  { %v188_v39 = vmax.f32 %v1507_v38, 0.0   ;;  %v154_v40 = vpop.f32.mrb[5].mxu0 }
  0xe5   :  { %v187_v41 = vmax.f32 %v154_v40, 0.0  }
  0xe6 LB: > { %v1601_v42 = vpack.c.bf16 %v2017_v14, %v2012_v13  ;;  %v1605_v43 = vpack.c.bf16 %v2027_v16, %v2022_v15  ;;  %vm222_vm4 = vcmask 261120   ;;  %v1609_v44 = vpack.c.bf16 %v2037_v18, %v2032_v17  ;;  %s207_s3 = sadd.s32 1, %s1919_s3   ;;  %s1919_s3 = sphi %s2074_s3, %s207_s3   ;;  %v1915_v28 = vphi %v183_v28, %v2275_v28   ;;  %v1911_v24 = vphi %v184_v24, %v2274_v24   ;;  %v1907_v36 = vphi %v185_v36, %v2273_v36   ;;  %v1903_v32 = vphi %v186_v32, %v2272_v32   ;;  %v1899_v41 = vphi %v187_v41, %v2271_v41   ;;  %v1895_v39 = vphi %v188_v39, %v2270_v39   ;;  %v1891_v29 = vphi %v189_v29, %v2269_v29   ;;  %v1887_v26 = vphi %v190_v26, %v2268_v26   ;;  %v1883_v37 = vphi %v191_v37, %v2267_v37   ;;  %v1879_v34 = vphi %v192_v34, %v2266_v34  }
  0xe7   : > { %1522 = vmatprep.mubr.msk.f32.mxu0 %vm222_vm4, %v1915_v28  ;;  %v1613_v45 = vpack.c.bf16 %v2047_v20, %v2042_v19  ;;  %v218_v46 = vlaneseq  ;;  %p204_p0 = scmp.ge.s32.totalorder %s207_s3, 4  }
  0xe8   : > { %1602 = vmatprep.subr.bf16.mxu0 %v1601_v42  ;;  %1610 = vmatprep.subr.bf16.mxu1 %v1609_v44  ;;  %vm2188_vm5 = vmpackc.low (%p204_p0), %vm222_vm4, %vm222_vm4  ;;  %s1925_s4 = smov (%p204_p0), 16   ;;  %s1926_s6 = smov (%p204_p0), 32   ;;  %vm1303_vm6 = vcmask (%p204_p0), 130048   ;;  %vm1306_vm7 = vcmask (%p204_p0), 392192   ;;  %vm1308_vm8 = vcmask (%p204_p0), 523264   ;;  %vm1312_vm9 = vcmask (%p204_p0), 785408  }
  0xe9   : > { %1604 = vmatpush3.bf16.msra.mxu0 %v1601_v42  ;;  %1612 = vmatpush3.bf16.msra.mxu1 %v1609_v44  ;;  %v2137_v47 = vshrl.u32 %v218_v46, 7  ;;  %s1927_s7 = smov (%p204_p0), 48   ;;  %s1928_s8 = smov (%p204_p0), 64   ;;  %vm1310_vm10 = vcmask (%p204_p0), 654336   ;;  %vm1314_vm11 = vcmask (%p204_p0), 916480  }
  0xea   : > { %1606 = vmatprep.subr.bf16.mxu0 %v1605_v43  ;;  %1614 = vmatprep.subr.bf16.mxu1 %v1613_v45  ;;  %s1929_s9 = smov (%p204_p0), 80   ;;  %s1930_s10 = smov (%p204_p0), 96  }
  0xeb   : > { %v220_v48 = vsub.s32 0, %v2137_v47  ;;  %v380_v27 = vsub.s32 1, %v2137_v47  ;;  %s1931_s11 = smov (%p204_p0), 112   ;;  %s1932_s12 = smov (%p204_p0), [#allocation2]  }
  0xec   :  { %s1331_s13 = sshll.u32 (%p204_p0), %s1932_s12, 4  ;;  %s1332_s13 = int_to_ptr.vmem [resolvable:$true] %s1331_s13 }
  0xed   : > { %1608 = vmatpush3.bf16.msra.mxu0 %v1605_v43  ;;  %1616 = vmatpush3.bf16.msra.mxu1 %v1613_v45  ;;  %v221_v49 = vrot.slane %v2052_v21, %v220_v48  ;;  %v381_v30 = vrot.slane %v2052_v21, %v380_v27  ;;  %s1809_s14 = scalar_lea.vmem (%p204_p0), %s1332_s13, 256  ;;  %p1814_p2 = scmp.lt.s32.totalorder (%p204_p0), %s1332_s13, %s1332_s13 }
  0xee   :  { %p1810_p1 = scmp.ne.s32.totalorder (%p204_p0), %s1332_s13, %s1809_s14  ;;  %p1815_p3 = scmp.lt.s32.totalorder (%p204_p0), %s1809_s14, %s1809_s14 }
  0xf0   : > { %1523 = vmatmul.mubr.msk.f32.vlgmr.msra.gmra.mrb[0].mxu0 %vm222_vm4, %v1911_v24  ;;  %p1816_p4 = por (%p204_p0), %p1815_p3, %p1814_p2 }
  0xf1   : > { %1525 = vmatprep.mubr.msk.f32.mxu0 %vm222_vm4, %v1907_v36 }
  0xf2   :  { %p1817_p5 = pnand (%p204_p0), %p1816_p4, %p1810_p1 }
  0xf4   : > { %1526 = vmatmul.mubr.msk.f32.gmra.mrb[2].mxu0 %vm222_vm4, %v1903_v32 }
  0xf5   : > { %1528 = vmatprep.mubr.msk.f32.mxu0 %vm222_vm4, %v1899_v41 }
  0xf8   : > { %1529 = vmatmul.mubr.msk.f32.gmra.mrb[4].mxu0 %vm222_vm4, %v1895_v39 }
  0xf9   : > { %1531 = vmatprep.mubr.msk.f32.mxu0 %vm222_vm4, %v1891_v29 }
  0xfc   : > { %1532 = vmatmul.mubr.msk.f32.gmra.mrb[6].mxu0 %vm222_vm4, %v1887_v26 }
  0xfd   : > { %1534 = vmatprep.mubr.msk.f32.mxu0 %vm222_vm4, %v1883_v37 }
 0x100   : > { %1535 = vmatmul.mubr.msk.f32.gmra.mrb[8].mxu0 %vm222_vm4, %v1879_v34 }
 0x1c3   : > { %v1524_v50 = vpop.f32.mrb[0].mxu0 }
 0x1c4   : > { %v325_v51 = vadd.f32 %v1524_v50, %v221_v49  ;;  %v319_v52 = vpop.f32.mrb[1].mxu0 }
 0x1c5   : > { %v320_v53 = vadd.f32 %v319_v52, %v221_v49 }
 0x1c7   : > { %1749 = vtanh.f32 %v320_v53  ;;  %v1527_v54 = vpop.f32.mrb[2].mxu0 }
 0x1c8   : > { %1751 = vtanh.f32 %v325_v51  ;;  %v335_v55 = vadd.f32 %v1527_v54, %v221_v49  ;;  %v329_v56 = vpop.f32.mrb[3].mxu0 }
 0x1c9   : > { %v330_v57 = vadd.f32 %v329_v56, %v221_v49 }
 0x1cb   : > { %1753 = vtanh.f32 %v330_v57  ;;  %v1530_v58 = vpop.f32.mrb[4].mxu0 }
 0x1cc   : > { %1755 = vtanh.f32 %v335_v55  ;;  %v345_v59 = vadd.f32 %v1530_v58, %v221_v49  ;;  %v339_v60 = vpop.f32.mrb[5].mxu0 }
 0x1cd   : > { %v340_v61 = vadd.f32 %v339_v60, %v221_v49 }
 0x1cf   : > { %1757 = vtanh.f32 %v340_v61  ;;  %v1533_v62 = vpop.f32.mrb[6].mxu0 }
 0x1d0   : > { %1759 = vtanh.f32 %v345_v59  ;;  %v355_v63 = vadd.f32 %v1533_v62, %v221_v49  ;;  %v349_v0 = vpop.f32.mrb[7].mxu0 }
 0x1d1   : > { %v1750_v1 = vpop.eup %1749  ;;  %v350_v2 = vadd.f32 %v349_v0, %v221_v49 }
 0x1d2   : > { %v1752_v3 = vpop.eup %1751  ;;  %1545 = vmatprep.mubr.msk.f32.mxu1 %vm222_vm4, %v1750_v1 }
 0x1d3   : > { %1761 = vtanh.f32 %v350_v2  ;;  %v1536_v4 = vpop.f32.mrb[8].mxu0  ;;  %1546 = vmatmul.mubr.msk.f32.vlgmr.msra.gmra.mrb[0].mxu1 %vm222_vm4, %v1752_v3 }
 0x1d4   : > { %1763 = vtanh.f32 %v355_v63  ;;  %v365_v5 = vadd.f32 %v1536_v4, %v221_v49  ;;  %v359_v6 = vpop.f32.mrb[9].mxu0 }
 0x1d5   : > { %v1754_v7 = vpop.eup %1753  ;;  %v360_v8 = vadd.f32 %v359_v6, %v221_v49 }
 0x1d6   : > { %v1756_v9 = vpop.eup %1755  ;;  %1548 = vmatprep.mubr.msk.f32.mxu1 %vm222_vm4, %v1754_v7 }
 0x1d7   : > { %1765 = vtanh.f32 %v360_v8  ;;  %1549 = vmatmul.mubr.msk.f32.gmra.mrb[2].mxu1 %vm222_vm4, %v1756_v9 }
 0x1d8   : > { %1767 = vtanh.f32 %v365_v5 }
 0x1d9   : > { %v1758_v10 = vpop.eup %1757 }
 0x1da   : > { %v1760_v11 = vpop.eup %1759  ;;  %1551 = vmatprep.mubr.msk.f32.mxu1 %vm222_vm4, %v1758_v10 }
 0x1db   : > { %1552 = vmatmul.mubr.msk.f32.gmra.mrb[4].mxu1 %vm222_vm4, %v1760_v11 }
 0x1dd   : > { %v1762_v12 = vpop.eup %1761 }
 0x1de   : > { %v1764_v22 = vpop.eup %1763  ;;  %1554 = vmatprep.mubr.msk.f32.mxu1 %vm222_vm4, %v1762_v12 }
 0x1df   : > { %1555 = vmatmul.mubr.msk.f32.gmra.mrb[6].mxu1 %vm222_vm4, %v1764_v22 }
 0x1e1   : > { %v1766_v23 = vpop.eup %1765 }
 0x1e2   : > { %v1768_v25 = vpop.eup %1767  ;;  %1557 = vmatprep.mubr.msk.f32.mxu1 %vm222_vm4, %v1766_v23 }
 0x1e3   : > { %1558 = vmatmul.mubr.msk.f32.gmra.mrb[8].mxu1 %vm222_vm4, %v1768_v25 }
 0x2a6   : > { %v1547_v31 = vpop.f32.mrb[0].mxu1 }
 0x2a7   : > { %v484_v33 = vadd.f32 %v1547_v31, %v381_v30  ;;  %v478_v35 = vpop.f32.mrb[1].mxu1 }
 0x2a8   : > { %v479_v38 = vadd.f32 %v478_v35, %v381_v30 }
 0x2a9   : > { %v528_v40 = vmul.f32 0.25, %v484_v33 }
 0x2aa   : > { %v527_v42 = vmul.f32 0.25, %v479_v38  ;;  %v1550_v43 = vpop.f32.mrb[2].mxu1 }
 0x2ab   : > { %v538_v44 = vadd.f32 %v1911_v24, %v528_v40   ;;  %v494_v45 = vadd.f32 %v1550_v43, %v381_v30  ;;  %v488_v46 = vpop.f32.mrb[3].mxu1 }
 0x2ac   : > { %v537_v48 = vadd.f32 %v1915_v28, %v527_v42   ;;  %v489_v49 = vadd.f32 %v488_v46, %v381_v30 }
 0x2ad   : > { %v530_v50 = vmul.f32 0.25, %v494_v45 }
 0x2ae   : > { %v529_v51 = vmul.f32 0.25, %v489_v49  ;;  %v1553_v52 = vpop.f32.mrb[4].mxu1  ;;  %v1617_v10 = vpack.c.bf16 (%p204_p0), %v538_v44, %v537_v48  ;;  %1564 = vmatprep.mubr.msk.f32.mxu0 (%p204_p0), %vm222_vm4, %v537_v48 }
 0x2af   : > { %v540_v53 = vadd.f32 %v1903_v32, %v530_v50   ;;  %v504_v54 = vadd.f32 %v1553_v52, %v381_v30  ;;  %v498_v55 = vpop.f32.mrb[5].mxu1 }
 0x2b0   : > { %v539_v56 = vadd.f32 %v1907_v36, %v529_v51   ;;  %v499_v57 = vadd.f32 %v498_v55, %v381_v30  ;;  %1619 = vmatprep.subr.msk.bf16.mxu0 (%p204_p0), %vm2188_vm5, %v1617_v10 }
 0x2b1   : > { %v532_v58 = vmul.f32 0.25, %v504_v54  ;;  %1622 = vmatpush3.bf16.xpose.msk.msra.mxu0 (%p204_p0), %vm2188_vm5, %v1617_v10 }
 0x2b2   : > { %v531_v59 = vmul.f32 0.25, %v499_v57  ;;  %v1556_v60 = vpop.f32.mrb[6].mxu1  ;;  %v1623_v12 = vpack.c.bf16 (%p204_p0), %v540_v53, %v539_v56  ;;  %1571 = vmatprep.mubr.msk.f32.mxu1 (%p204_p0), %vm222_vm4, %v539_v56  ;;  %v1922_v57 = vmov (%p204_p0), 1983009808  }
 0x2b3   : > { %v542_v61 = vadd.f32 %v1895_v39, %v532_v58   ;;  %v514_v24 = vadd.f32 %v1556_v60, %v381_v30  ;;  %v508_v62 = vpop.f32.mrb[7].mxu1  ;;  %v1016_v58 = vunpack.c.l.s4 (%p204_p0), %v1922_v57 }
 0x2b4   : > { %v541_v63 = vadd.f32 %v1899_v41, %v531_v59   ;;  %v509_v28 = vadd.f32 %v508_v62, %v381_v30  ;;  %1625 = vmatprep.subr.msk.bf16.mxu1 (%p204_p0), %vm2188_vm5, %v1623_v12 }
 0x2b5   : > { %v534_v0 = vmul.f32 0.25, %v514_v24  ;;  %v2270_v39 = vmov %v542_v61  ;;  %v2274_v24 = vmov %v538_v44  ;;  %1628 = vmatpush3.bf16.xpose.msk.msra.mxu1 (%p204_p0), %vm2188_vm5, %v1623_v12 }
 0x2b6   : > { %v533_v1 = vmul.f32 0.25, %v509_v28  ;;  %v1559_v2 = vpop.f32.mrb[8].mxu1  ;;  %v2271_v41 = vmov %v541_v63  ;;  %v2275_v28 = vmov %v537_v48  ;;  %v1629_v22 = vpack.c.bf16 (%p204_p0), %v542_v61, %v541_v63 }
 0x2b7   : > { %v544_v3 = vadd.f32 %v1887_v26, %v534_v0   ;;  %v524_v32 = vadd.f32 %v1559_v2, %v381_v30  ;;  %v518_v4 = vpop.f32.mrb[9].mxu1  ;;  %v1923_v28 = vmov (%p204_p0), 1934713408  }
 0x2b8   : > { %v543_v5 = vadd.f32 %v1891_v29, %v533_v1   ;;  %v519_v36 = vadd.f32 %v518_v4, %v381_v30  ;;  %206 = sbr.rel (!%p204_p0) target bundleno = 230 (0xe6), region = 47  ;;  %1631 = vmatprep.subr.msk.bf16.mxu0 (%p204_p0), %vm2188_vm5, %v1629_v22  ;;  %1565 = vmatmul.mubr.msk.f32.vlgmr.msra.gmra.mrb[0].mxu0 (%p204_p0), %vm222_vm4, %v538_v44  ;;  %v1063_v0 = vunpack.c.l.s4 (%p204_p0), %v1923_v28 }
 0x2b9   : > { %v536_v6 = vmul.f32 0.25, %v524_v32  ;;  %v2268_v26 = vmov %v544_v3  ;;  %v2272_v32 = vmov %v540_v53  ;;  %1634 = vmatpush3.bf16.xpose.msk.msra.mxu0 (%p204_p0), %vm2188_vm5, %v1629_v22  ;;  %1578 = vmatprep.mubr.msk.f32.mxu0 (%p204_p0), %vm222_vm4, %v541_v63 }
 0x2ba   : > { %v535_v7 = vmul.f32 0.25, %v519_v36  ;;  %v2269_v29 = vmov %v543_v5  ;;  %v2273_v36 = vmov %v539_v56  ;;  %v1635_v23 = vpack.c.bf16 (%p204_p0), %v544_v3, %v543_v5 }
 0x2bb   : > { %v546_v8 = vadd.f32 %v1879_v34, %v536_v6   ;;  %v1064_v36 = vunpack.c.0.s8 (%p204_p0), %v1063_v0 }
 0x2bc   : > { %v545_v9 = vadd.f32 %v1883_v37, %v535_v7   ;;  %1637 = vmatprep.subr.msk.bf16.mxu1 (%p204_p0), %vm2188_vm5, %v1635_v23  ;;  %1572 = vmatmul.mubr.msk.f32.vlgmr.msra.gmra.mrb[0].mxu1 (%p204_p0), %vm222_vm4, %v540_v53 }
 0x2bd   : > { %v2266_v34 = vmov %v546_v8  ;;  %1640 = vmatpush3.bf16.xpose.msk.msra.mxu1 (%p204_p0), %vm2188_vm5, %v1635_v23  ;;  %1585 = vmatprep.mubr.msk.f32.mxu1 (%p204_p0), %vm222_vm4, %v543_v5 }
 0x2be   : > { %v2267_v37 = vmov %v545_v9  ;;  %v1641_v13 = vpack.c.bf16 (%p204_p0), %v546_v8, %v545_v9 }
 0x2c0   :  { %1643 = vmatprep.subr.msk.bf16.mxu0 %vm2188_vm5, %v1641_v13  ;;  %1579 = vmatmul.mubr.msk.f32.vlgmr.msra.gmra.mrb[2].mxu0 %vm222_vm4, %v542_v61  ;;  %v1017_v61 = vunpack.c.0.s8 %v1016_v58 }
 0x2c1   :  { %1646 = vmatpush3.bf16.xpose.msk.msra.mxu0 %vm2188_vm5, %v1641_v13  ;;  %1592 = vmatprep.mubr.msk.f32.mxu0 %vm222_vm4, %v545_v9 }
 0x2c2   :  { %v1020_v32 = vsub.s32 %v1017_v61, %v2137_v47 }
 0x2c4   :  { %1586 = vmatmul.mubr.msk.f32.vlgmr.msra.gmra.mrb[2].mxu1 %vm222_vm4, %v544_v3 }
 0x2c8   :  { %1593 = vmatmul.mubr.msk.f32.vlgmr.msra.gmra.mrb[4].mxu0 %vm222_vm4, %v546_v8 }
 0x38b   :  { %v1566_v14 = vpop.f32.mrb[0].mxu0 }
 0x38c   :  { %v1426_v16 = vmul.f32 -1.442695, %v1566_v14  ;;  %v620_v17 = vpop.f32.mrb[1].mxu0 }
 0x38d   :  { %v1425_v20 = vmul.f32 -1.442695, %v620_v17 }
 0x38e   :  { %1769 = vpow2.f32 %v1426_v16 }
 0x38f   :  { %v1573_v15 = vpop.f32.mrb[0].mxu1  ;;  %1771 = vpow2.f32 %v1425_v20 }
 0x390   :  { %v1428_v18 = vmul.f32 -1.442695, %v1573_v15  ;;  %v701_v19 = vpop.f32.mrb[1].mxu1 }
 0x391   :  { %v1427_v21 = vmul.f32 -1.442695, %v701_v19 }
 0x392   :  { %1773 = vpow2.f32 %v1428_v18  ;;  %v1067_v18 = vsub.s32 %v1064_v36, %v2137_v47 }
 0x393   :  { %1775 = vpow2.f32 %v1427_v21  ;;  %v1580_v26 = vpop.f32.mrb[2].mxu0 }
 0x394   :  { %v1430_v34 = vmul.f32 -1.442695, %v1580_v26  ;;  %v782_v39 = vpop.f32.mrb[3].mxu0 }
 0x395   :  { %v1429_v25 = vmul.f32 -1.442695, %v782_v39 }
 0x396   :  { %1777 = vpow2.f32 %v1430_v34 }
 0x397   :  { %v1587_v29 = vpop.f32.mrb[2].mxu1 }
 0x398   :  { %v1432_v37 = vmul.f32 -1.442695, %v1587_v29  ;;  %v863_v41 = vpop.f32.mrb[3].mxu1  ;;  %v1770_v30 = vpop.eup %1769 }
 0x399   :  { %v1431_v27 = vmul.f32 -1.442695, %v863_v41  ;;  %v1772_v31 = vpop.eup %1771  ;;  %v984_v33 = vadd.f32 1.0, %v1770_v30 }
 0x39a   :  { %1779 = vpow2.f32 %v1432_v37  ;;  %v983_v38 = vadd.f32 1.0, %v1772_v31 }
 0x39b   :  { %1781 = vpow2.f32 %v1429_v25  ;;  %v1594_v42 = vpop.f32.mrb[4].mxu0 }
 0x39c   :  { %1783 = vpow2.f32 %v1431_v27  ;;  %v1774_v35 = vpop.eup %1773  ;;  %v1434_v43 = vmul.f32 -1.442695, %v1594_v42  ;;  %v944_v44 = vpop.f32.mrb[5].mxu0 }
 0x39d   :  { %v1776_v40 = vpop.eup %1775  ;;  %1785 = vrcp.f32 %v984_v33  ;;  %v986_v45 = vadd.f32 1.0, %v1774_v35  ;;  %v1433_v46 = vmul.f32 -1.442695, %v944_v44 }
 0x39e   :  { %1787 = vrcp.f32 %v983_v38  ;;  %v985_v48 = vadd.f32 1.0, %v1776_v40  ;;  %v1924_v40 = vmov 0.0  }
 0x39f   :  { %1789 = vpow2.f32 %v1434_v43 }
 0x3a0   :  { %v1778_v49 = vpop.eup %1777  ;;  %1791 = vpow2.f32 %v1433_v46 }
 0x3a1   :  { %1793 = vrcp.f32 %v986_v45  ;;  %v988_v51 = vadd.f32 1.0, %v1778_v49 }
 0x3a2   :  { %1795 = vrcp.f32 %v985_v48 }
 0x3a3   :  { %1797 = vrcp.f32 %v988_v51 }
 0x3a4   :  { %v1780_v50 = vpop.eup %1779 }
 0x3a5   :  { %v1782_v52 = vpop.eup %1781  ;;  %v990_v53 = vadd.f32 1.0, %v1780_v50 }
 0x3a6   :  { %v1784_v54 = vpop.eup %1783  ;;  %v987_v55 = vadd.f32 1.0, %v1782_v52 }
 0x3a7   :  { %1799 = vrcp.f32 %v990_v53  ;;  %v989_v56 = vadd.f32 1.0, %v1784_v54  ;;  %v1786_v59 = vpop.eup %1785 }
 0x3a8   :  { %1801 = vrcp.f32 %v987_v55  ;;  %v1788_v60 = vpop.eup %1787 }
 0x3a9   :  { %1803 = vrcp.f32 %v989_v56  ;;  %v1790_v24 = vpop.eup %1789 }
 0x3aa   :  { %v1792_v62 = vpop.eup %1791  ;;  %v992_v63 = vadd.f32 1.0, %v1790_v24 }
 0x3ab   :  { %v1794_v1 = vpop.eup %1793  ;;  %v991_v2 = vadd.f32 1.0, %v1792_v62 }
 0x3ac   :  { %v1796_v3 = vpop.eup %1795  ;;  %1805 = vrcp.f32 %v992_v63 }
 0x3ad   :  { %v1798_v4 = vpop.eup %1797  ;;  %1807 = vrcp.f32 %v991_v2 }
 0x3ae   :  { %v1130_v6 = vcombine.low %v1786_v59, %v1798_v4  ;;  %v1131_v7 = vcombine.high %v1786_v59, %v1798_v4 }
 0x3b0   :  { %v1138_v12 = vrot.slane %v1130_v6, %v1020_v32  ;;  %v2223_v23 = vrot.slane %v1131_v7, %v1020_v32 }
 0x3b1   :  { %v1800_v5 = vpop.eup %1799 }
 0x3b2   :  { %v1802_v8 = vpop.eup %1801  ;;  %v1146_v9 = vcombine.low %v1794_v1, %v1800_v5  ;;  %v1147_v10 = vcombine.high %v1794_v1, %v1800_v5 }
 0x3b3   :  { %v1804_v11 = vpop.eup %1803  ;;  %v1013_v22 = vcombine.low %v1788_v60, %v1802_v8  ;;  %v1014_v13 = vcombine.high %v1788_v60, %v1802_v8 }
 0x3b4   :  { %v1154_v14 = vrot.slane %v1146_v9, %v1020_v32  ;;  %v1029_v15 = vcombine.low %v1796_v3, %v1804_v11  ;;  %v1161_v16 = vrot.slane %v1147_v10, %v1020_v32  ;;  %v1030_v17 = vcombine.high %v1796_v3, %v1804_v11 }
 0x3b5   :  { %v1021_v19 = vrot.slane %v1013_v22, %v1020_v32  ;;  %v1028_v20 = vrot.slane %v1014_v13, %v1020_v32 }
 0x3b6   :  { %v1177_v21 = vcombine.low %v1138_v12, %v1154_v14  ;;  %v1178_v26 = vcombine.high %v1138_v12, %v1154_v14  ;;  %v1037_v29 = vrot.slane %v1029_v15, %v1020_v32  ;;  %v1193_v34 = vcombine.low %v2223_v23, %v1161_v16  ;;  %v1806_v27 = vpop.eup %1805 }
 0x3b7   :  { %v1044_v37 = vrot.slane %v1030_v17, %v1020_v32  ;;  %v1194_v39 = vcombine.high %v2223_v23, %v1161_v16  ;;  %v1808_v33 = vpop.eup %1807  ;;  %v1169_v35 = vrot.slane %v1806_v27, %v1020_v32  ;;  %v1162_v42 = vcombine.high %v1806_v27, %v1924_v40 }
 0x3b8   :  { %v1060_v41 = vcombine.low %v1021_v19, %v1037_v29  ;;  %v1061_v25 = vcombine.high %v1021_v19, %v1037_v29  ;;  %v2228_v38 = vrot.slane %v1177_v21, %v1067_v18  ;;  %v1192_v47 = vrot.slane %v1178_v26, %v1067_v18 }
 0x3b9   :  { %v1076_v30 = vcombine.low %v1028_v20, %v1044_v37  ;;  %v1077_v31 = vcombine.high %v1028_v20, %v1044_v37  ;;  %v1052_v43 = vrot.slane %v1808_v33, %v1020_v32  ;;  %v1201_v45 = vrot.slane %v1193_v34, %v1067_v18 }
 0x3ba   :  { %v2230_v44 = vrot.slane %v1060_v41, %v1067_v18  ;;  %v1045_v46 = vcombine.high %v1808_v33, %v1924_v40  ;;  %v2232_v48 = vrot.slane %v1169_v35, %v1067_v18  ;;  %v1209_v49 = vcombine.high %v1169_v35, %v1924_v40 }
 0x3bb   :  { %v1075_v50 = vrot.slane %v1061_v25, %v1067_v18  ;;  %v1176_v51 = vrot.slane %v1162_v42, %v1020_v32  ;;  %v2234_v52 = vrot.slane %v1052_v43, %v1067_v18  ;;  %v1092_v53 = vcombine.high %v1052_v43, %v1924_v40 }
 0x3bc   :  { %v1059_v54 = vrot.slane %v1045_v46, %v1020_v32  ;;  %v1084_v55 = vrot.slane %v1076_v30, %v1067_v18  ;;  %v1240_v56 = vcombine.high %v2228_v38, %v2232_v48  ;;  %v1239_v57 = vcombine.low %v2228_v38, %v2232_v48 }
 0x3bd   :  { %v1223_v58 = vrot.slane %v1209_v49, %v1067_v18  ;;  %v1231_v59 = vrot.slane %v1176_v51, %v1067_v18  ;;  %v1123_v60 = vcombine.high %v2230_v44, %v2234_v52  ;;  %v1106_v61 = vrot.slane %v1092_v53, %v1067_v18 }
 0x3be   :  { %v1114_v24 = vrot.slane %v1059_v54, %v1067_v18  ;;  %v1107_v62 = vcombine.high %v1059_v54, %v1924_v40  ;;  %1276 = vrot.lane.b32.xlu0 %v1240_v56, %s1925_s4  ;;  %v1091_v5 = vrot.slane %v1077_v31, %v1067_v18  ;;  %v1224_v6 = vcombine.high %v1176_v51, %v1924_v40 }
 0x3bf   :  { %v1241_v63 = vcombine.low %v1192_v47, %v1223_v58  ;;  %v1242_v28 = vcombine.high %v1192_v47, %v1223_v58  ;;  %v1243_v0 = vcombine.low %v1201_v45, %v1231_v59  ;;  %v1244_v1 = vcombine.high %v1201_v45, %v1231_v59 }
 0x3c0   :  { %v1125_v2 = vcombine.high %v1075_v50, %v1106_v61  ;;  %v1126_v3 = vcombine.low %v1084_v55, %v1114_v24  ;;  %v1127_v32 = vcombine.high %v1084_v55, %v1114_v24  ;;  %v1124_v4 = vcombine.low %v1075_v50, %v1106_v61 }
 0x3c1   :  { %1280 = vrot.lane.b32.xlu1 %v1241_v63, %s1926_s6  ;;  %v1121_v36 = vrot.slane %v1107_v62, %v1067_v18  ;;  %v1122_v7 = vcombine.low %v2230_v44, %v2234_v52  ;;  %v1208_v9 = vrot.slane %v1194_v39, %v1067_v18  ;;  %v1238_v10 = vrot.slane %v1224_v6, %v1067_v18 }
 0x3c2   :  { %1248 = vrot.lane.b32.xlu0 %v1123_v60, %s1925_s4 }
 0x3c3   :  { %v1128_v8 = vcombine.low %v1091_v5, %v1121_v36  ;;  %v1129_v11 = vcombine.high %v1091_v5, %v1121_v36  ;;  %v1245_v12 = vcombine.low %v1208_v9, %v1238_v10  ;;  %v1246_v22 = vcombine.high %v1208_v9, %v1238_v10 }
 0x3c5   :  { %1284 = vrot.lane.b32.xlu1 %v1242_v28, %s1927_s7 }
 0x3c6   :  { %1256 = vrot.lane.b32.xlu0 %v1125_v2, %s1927_s7 }
 0x3c9   :  { %1288 = vrot.lane.b32.xlu1 %v1243_v0, %s1928_s8 }
 0x3ca   :  { %1260 = vrot.lane.b32.xlu0 %v1126_v3, %s1928_s8 }
 0x3cd   :  { %1292 = vrot.lane.b32.xlu1 %v1244_v1, %s1929_s9 }
 0x3ce   :  { %1264 = vrot.lane.b32.xlu0 %v1127_v32, %s1929_s9 }
 0x3d1   :  { %1252 = vrot.lane.b32.xlu1 %v1124_v4, %s1926_s6 }
 0x3d2   :  { %1268 = vrot.lane.b32.xlu0 %v1128_v8, %s1930_s10 }
 0x3d5   :  { %1296 = vrot.lane.b32.xlu1 %v1245_v12, %s1930_s10 }
 0x3d6   :  { %1272 = vrot.lane.b32.xlu0 %v1129_v11, %s1931_s11 }
 0x3d9   :  { %1300 = vrot.lane.b32.xlu1 %v1246_v22, %s1931_s11 }
 0x430   :  { %v1277_v23 = vpop.permute.xlu0 %1276 }
 0x431   :  { %v1316_v29 = vsel %vm1303_vm6, %v1239_v57, %v1277_v23 }
 0x433   :  { %v1281_v13 = vpop.permute.xlu1 %1280 }
 0x434   :  { %v1249_v14 = vpop.permute.xlu0 %1248  ;;  %v1317_v25 = vsel %vm222_vm4, %v1316_v29, %v1281_v13 }
 0x435   :  { %v1304_v21 = vsel %vm1303_vm6, %v1122_v7, %v1249_v14 }
 0x437   :  { %v1285_v15 = vpop.permute.xlu1 %1284 }
 0x438   :  { %v1257_v16 = vpop.permute.xlu0 %1256  ;;  %v1318_v31 = vsel %vm1306_vm7, %v1317_v25, %v1285_v15 }
 0x43b   :  { %v1289_v17 = vpop.permute.xlu1 %1288 }
 0x43c   :  { %v1261_v18 = vpop.permute.xlu0 %1260  ;;  %v1319_v35 = vsel %vm1308_vm8, %v1318_v31, %v1289_v17 }
 0x43f   :  { %v1293_v19 = vpop.permute.xlu1 %1292 }
 0x440   :  { %v1265_v20 = vpop.permute.xlu0 %1264  ;;  %v1320_v47 = vsel %vm1310_vm10, %v1319_v35, %v1293_v19 }
 0x443   :  { %v1253_v26 = vpop.permute.xlu1 %1252 }
 0x444   :  { %v1305_v34 = vsel %vm222_vm4, %v1304_v21, %v1253_v26  ;;  %v1269_v39 = vpop.permute.xlu0 %1268 }
 0x445   :  { %v1307_v37 = vsel %vm1306_vm7, %v1305_v34, %v1257_v16 }
 0x446   :  { %v1309_v41 = vsel %vm1308_vm8, %v1307_v37, %v1261_v18 }
 0x447   :  { %v1311_v27 = vsel %vm1310_vm10, %v1309_v41, %v1265_v20  ;;  %v1297_v30 = vpop.permute.xlu1 %1296 }
 0x448   :  { %v1313_v33 = vsel %vm1312_vm9, %v1311_v27, %v1269_v39  ;;  %v1273_v38 = vpop.permute.xlu0 %1272  ;;  %v1321_v42 = vsel %vm1312_vm9, %v1320_v47, %v1297_v30 }
 0x449   :  { %v1315_v40 = vsel %vm1314_vm11, %v1313_v33, %v1273_v38 }
 0x44a   :  { %1323 = vst [vmem:[#allocation2] sm:$0x1f] %v1315_v40 }
 0x44b   :  { %v1301_v43 = vpop.permute.xlu1 %1300 }
 0x44c   :  { %v1322_v44 = vsel %vm1314_vm11, %v1321_v42, %v1301_v43 }
 0x44d   :  { %1324 = vst [vmem:[#allocation2 + $0x8] sm:$0x1f] %v1322_v44 }
 0x44e   :  { %1820 = shalt.err (!%p1817_p5)
}
 0x44f   :  { %s1821_s17 = scalar_lea.hbm %s2265_s5, 256 }
 0x450   :  { %p1822_p6 = scmp.ne.s32.totalorder %s2265_s5, %s1821_s17  ;;  %p1825_p7 = scmp.lt.u32.totalorder %s1821_s17, %s2265_s5 }
 0x452   :  { %p1827_p8 = pnand %p1825_p7, %p1822_p6 }
 0x454   :  { %1830 = shalt.err (!%p1827_p8)
}
 0x455   :  { %1334 = dma.vmem_to_hbm [thread:$0]  %s1332_s13, 256, %s2265_s5, [#allocation3]  }
 0x456   :  { %1875 = dma.done.wait [#allocation3], 256  }
 0x457   :  { %1876 = vsyncadd [#allocation3], 4294967040 }
 0x458   :  { %1338 = vsyncpa [#allocation3], 1 }

</bundles_post_ra>
